<compile_context>
chip_gen: v6e
topology: v6e:2x2x1
jax: 0.10.0
libtpu: 0.0.40
codegen_flags: <defaults>
</compile_context>

<pallas_src>
import functools

import jax
import jax.numpy as jnp
from jax import lax
from jax.experimental import pallas as pl
from jax.experimental.pallas import tpu as pltpu


# ---------------------------------------------------------------------------
# small helpers
# ---------------------------------------------------------------------------
def _round_up(n, m):
    return ((n + m - 1) // m) * m


def _round_down(n, m):
    return (n // m) * m


def _vmem_capacity_bytes():
    """Physical per-core VMEM; conservative fallback = v7x's 64 MiB."""
    try:
        info = pltpu.get_tpu_info()
        cap = getattr(info, "vmem_capacity_bytes", None)
        if cap:
            return int(cap)
    except Exception:
        pass
    return 64 * 1024 * 1024


@functools.lru_cache(maxsize=None)
def _single_buffer_supported():
    """Probe once whether pipeline_mode=pl.Buffered(1) lowers on this JAX/libtpu."""
    try:
        def _probe(x_ref, o_ref):
            o_ref[...] = x_ref[...] + 1.0

        f = pl.pallas_call(
            _probe,
            grid=(2,),
            in_specs=[pl.BlockSpec((8, 128), lambda i: (0, 0),
                                   pipeline_mode=pl.Buffered(1))],
            out_specs=pl.BlockSpec((8, 128), lambda i: (0, 0)),
            out_shape=jax.ShapeDtypeStruct((8, 128), jnp.float32),
        )
        jax.block_until_ready(f(jnp.zeros((8, 128), jnp.float32)))
        return True
    except Exception:
        return False


def _resident_spec(shape):
    """Constant-index-map operand: stays VMEM-resident across grid steps.
    Single-buffered when supported (no point double-buffering a block whose
    index never changes; halves its footprint — matters on v7x's 64 MiB)."""
    index_map = lambda *_: (0,) * len(shape)
    if _single_buffer_supported():
        return pl.BlockSpec(shape, index_map, pipeline_mode=pl.Buffered(1))
    return pl.BlockSpec(shape, index_map)


def _pick_batch_tile(B, input_size, hidden, h2, oc, cache_h1, budget_bytes):
    """Derive the batch-tile row count from a VMEM byte budget."""
    # Streamed bytes per row: double-buffered x tile, double-buffered lane-dense
    # output tile, plus a 2x allowance for live intermediates / relayout copies.
    per_row = 4 * (2 * input_size + 2 * oc + 2 * (hidden + 2 * h2 + oc))
    if cache_h1:
        per_row += 16 * hidden        # h1 stream: 2-buf write (pass 1) + 2-buf read (pass 2)
    # Resident operands, counted at 2 buffers for safety even though we request Buffered(1).
    fixed = 8 * (input_size * hidden + hidden * h2 + h2 * h2 + h2 * oc) + (1 << 20)
    # TODO(synk): if `fixed` alone exceeds the budget (enormous input_size*hidden),
    # W1 itself would need K/N tiling; not needed for these model sizes.
    tb = max(8, (budget_bytes - fixed) // per_row)
    # Target a multi-MiB streamed tile for narrow feature widths, but keep the grid
    # step count sane (per-step overhead ~0.35us).
    row_cap = max(1024, (8 << 20) // (4 * max(input_size, hidden)))
    tb = min(tb, row_cap, _round_up(B, 8))
    return max(8, _round_down(tb, 8))


# ---------------------------------------------------------------------------
# Pass 1: per-core partial batch statistics of h1 = x @ W1
# ---------------------------------------------------------------------------
def _fc1_stats_kernel(x_ref, w1_ref, psum_ref, psq_ref, *h1_out, emit_h1):
    """fc1 bias is dropped: it cancels exactly under training-mode BatchNorm.
    Zero-padded batch rows therefore contribute exactly 0 to both accumulators,
    so no masking is needed; the wrapper divides by the true batch size."""
    step = pl.program_id(1)

    @pl.when(step == 0)
    def _init():
        psum_ref[...] = jnp.zeros_like(psum_ref)
        psq_ref[...] = jnp.zeros_like(psq_ref)

    h1 = jnp.dot(x_ref[...], w1_ref[...], preferred_element_type=jnp.float32)

    # TODO(synk): one-pass E[h^2] - E[h]^2 can cancel badly when |mean| >> std;
    # switch to a Welford/Chan per-tile combine if that regime shows up in real data.
    psum_ref[...] += jnp.sum(h1, axis=0, keepdims=True)
    psq_ref[...] += jnp.sum(h1 * h1, axis=0, keepdims=True)

    if emit_h1:                      # stream h1 to HBM so pass 2 can skip the fc1 recompute
        h1_out[0][...] = h1


# ---------------------------------------------------------------------------
# Pass 2: folded-BN + MLP tail, lane-dense (128-wide) output slab
# ---------------------------------------------------------------------------
def _mlp_tail(h1, scale, shift, w2_ref, b2_ref, w3_ref, b3_ref, w4_ref, b4_ref,
              out_ref, out_size):
    a1 = jnp.maximum(h1 * scale + shift, 0.0)                         # folded BN + relu
    a2 = jnp.dot(a1, w2_ref[...], preferred_element_type=jnp.float32) + b2_ref[...]
    a3 = jnp.maximum(
        jnp.dot(a2, w3_ref[...], preferred_element_type=jnp.float32) + b3_ref[...], 0.0)
    logits = jnp.dot(a3, w4_ref[...], preferred_element_type=jnp.float32) + b4_ref[...]

    # log_softmax over the lane-padded class axis: masked lane reduction (XLU is idle
    # here); the padded columns are garbage and are sliced off by the wrapper.
    col = lax.broadcasted_iota(jnp.int32, logits.shape, 1)
    valid = col < out_size
    m = jnp.max(jnp.where(valid, logits, -jnp.inf), axis=-1, keepdims=True)
    s = jnp.sum(jnp.where(valid, jnp.exp(logits - m), 0.0), axis=-1, keepdims=True)
    out_ref[...] = (logits - (m + jnp.log(s))).astype(out_ref.dtype)


def _mlp_from_x_kernel(x_ref, w1_ref, scale_ref, shift_ref,
                       w2_ref, b2_ref, w3_ref, b3_ref, w4_ref, b4_ref,
                       out_ref, *, out_size):
    h1 = jnp.dot(x_ref[...], w1_ref[...], preferred_element_type=jnp.float32)
    _mlp_tail(h1, scale_ref[...], shift_ref[...],
              w2_ref, b2_ref, w3_ref, b3_ref, w4_ref, b4_ref, out_ref, out_size)


def _mlp_from_h1_kernel(h1_ref, scale_ref, shift_ref,
                        w2_ref, b2_ref, w3_ref, b3_ref, w4_ref, b4_ref,
                        out_ref, *, out_size):
    _mlp_tail(h1_ref[...], scale_ref[...], shift_ref[...],
              w2_ref, b2_ref, w3_ref, b3_ref, w4_ref, b4_ref, out_ref, out_size)


# ---------------------------------------------------------------------------
# wrapper
# ---------------------------------------------------------------------------
def malware_identifier_forward(x, params, *, batch_tile=None):
    """x: [B, input_size] float32.  params: dict from init_params."""
    B, input_size = x.shape
    hidden = params["w1"].shape[1]
    h2 = params["w2"].shape[1]
    out_size = params["w4"].shape[1]
    oc = _round_up(out_size, 128)                 # lane-dense padded class dim

    # Stream h1 instead of re-reading x / recomputing fc1 when it is cheaper.
    cache_h1 = (2 * hidden) <= input_size

    vmem_cap = _vmem_capacity_bytes()
    vmem_limit = int(vmem_cap * 3 // 4)           # explicit: v5e default scoped is only 16 MiB
    budget = vmem_limit - (4 << 20)               # headroom for compiler scratch

    if batch_tile is None:
        tb = _pick_batch_tile(B, input_size, hidden, h2, oc, cache_h1, budget)
    else:
        tb = max(8, _round_down(min(batch_tile, _round_up(B, 8)), 8))

    n_tiles = pl.cdiv(B, tb)
    n_split = 2 if n_tiles >= 2 else 1            # feed both v7x TensorCores in pass 1
    tiles_per_split = pl.cdiv(n_tiles, n_split)
    n_tiles = n_split * tiles_per_split
    b_pad = n_tiles * tb
    x_p = jnp.pad(x, ((0, b_pad - B), (0, 0))) if b_pad != B else x

    # classes padded to a full 128-lane slab (unmasked vst); sliced back at the end
    w4p = jnp.pad(params["w4"], ((0, 0), (0, oc - out_size)))
    b4p = jnp.pad(params["b4"], ((0, 0), (0, oc - out_size)))

    x_tile_map = lambda c, i, t=tiles_per_split: (c * t + i, 0)

    # ---- pass 1: per-core partial sums of h1 -----------------------------------
    stats_out_shape = [
        jax.ShapeDtypeStruct((n_split * 8, hidden), jnp.float32),    # sum(h1)   per core
        jax.ShapeDtypeStruct((n_split * 8, hidden), jnp.float32),    # sum(h1^2) per core
    ]
    stats_out_specs = [
        pl.BlockSpec((8, hidden), lambda c, i: (c, 0)),
        pl.BlockSpec((8, hidden), lambda c, i: (c, 0)),
    ]
    if cache_h1:
        stats_out_shape.append(jax.ShapeDtypeStruct((b_pad, hidden), jnp.float32))
        stats_out_specs.append(pl.BlockSpec((tb, hidden), x_tile_map))

    stats = pl.pallas_call(
        functools.partial(_fc1_stats_kernel, emit_h1=cache_h1),
        grid=(n_split, tiles_per_split),
        in_specs=[
            pl.BlockSpec((tb, input_size), x_tile_map),              # x tile (streamed)
            _resident_spec((input_size, hidden)),                    # W1 (VMEM-resident)
        ],
        out_specs=stats_out_specs,
        out_shape=stats_out_shape,
        compiler_params=pltpu.CompilerParams(
            dimension_semantics=("parallel", "arbitrary"),
            vmem_limit_bytes=vmem_limit),
    )(x_p, params["w1"])

    if cache_h1:
        psum, psq, h1_cache = stats
    else:
        psum, psq = stats

    # ---- tiny finalize in plain JAX: combine per-core partials, fold BN --------
    n_valid = jnp.float32(B)
    tot_sum = psum.reshape(n_split, 8, hidden)[:, 0, :].sum(axis=0, keepdims=True)
    tot_sq = psq.reshape(n_split, 8, hidden)[:, 0, :].sum(axis=0, keepdims=True)
    mean = tot_sum / n_valid
    var = jnp.maximum(tot_sq / n_valid - mean * mean, 0.0)   # biased, as PyTorch train-mode
    scale = params["gamma"] * lax.rsqrt(var + 1e-5)
    shift = params["beta"] - mean * scale

    # ---- pass 2: folded-BN MLP tail, lane-dense output --------------------------
    common_specs = [
        _resident_spec((1, hidden)),       # scale
        _resident_spec((1, hidden)),       # shift
        _resident_spec((hidden, h2)),      # W2
        _resident_spec((1, h2)),           # b2
        _resident_spec((h2, h2)),          # W3
        _resident_spec((1, h2)),           # b3
        _resident_spec((h2, oc)),          # W4 (lane-padded)
        _resident_spec((1, oc)),           # b4 (lane-padded)
    ]
    out_spec = pl.BlockSpec((tb, oc), lambda i: (i, 0))
    out_shape = jax.ShapeDtypeStruct((b_pad, oc), jnp.float32)
    mlp_cp = pltpu.CompilerParams(dimension_semantics=("parallel",),
                                  vmem_limit_bytes=vmem_limit)

    if cache_h1:
        out = pl.pallas_call(
            functools.partial(_mlp_from_h1_kernel, out_size=out_size),
            grid=(n_tiles,),
            in_specs=[pl.BlockSpec((tb, hidden), lambda i: (i, 0))] + common_specs,
            out_specs=out_spec, out_shape=out_shape, compiler_params=mlp_cp,
        )(h1_cache, scale, shift, params["w2"], params["b2"],
          params["w3"], params["b3"], w4p, b4p)
    else:
        out = pl.pallas_call(
            functools.partial(_mlp_from_x_kernel, out_size=out_size),
            grid=(n_tiles,),
            in_specs=[pl.BlockSpec((tb, input_size), lambda i: (i, 0)),
                      _resident_spec((input_size, hidden))] + common_specs,
            out_specs=out_spec, out_shape=out_shape, compiler_params=mlp_cp,
        )(x_p, params["w1"], scale, shift, params["w2"], params["b2"],
          params["w3"], params["b3"], w4p, b4p)

    return out[:B, :out_size]


# ---------------------------------------------------------------------------
# parameters & pure-JAX reference
# ---------------------------------------------------------------------------
def init_params(key, input_size, hidden_size, output_size=3):
    """Deterministic synthetic parameters matching the PyTorch module shapes.
    Linear weights stored pre-transposed as [in, out]; biases / BN affine as [1, out].
    b1 exists (the module has it) but the kernels never load it — it cancels exactly
    under training-mode BatchNorm; the reference keeps it to prove the equivalence."""
    h2 = hidden_size // 2
    keys = jax.random.split(key, 8)

    def lin(kw, kb, fan_in, fan_out):
        bound = 1.0 / float(jnp.sqrt(jnp.float32(fan_in)))
        w = jax.random.uniform(kw, (fan_in, fan_out), jnp.float32, -bound, bound)
        b = jax.random.uniform(kb, (1, fan_out), jnp.float32, -bound, bound)
        return w, b

    w1, b1 = lin(keys[0], keys[1], input_size, hidden_size)
    w2, b2 = lin(keys[2], keys[3], hidden_size, h2)
    w3, b3 = lin(keys[4], keys[5], h2, h2)
    w4, b4 = lin(keys[6], keys[7], h2, output_size)

    return dict(
        w1=w1, b1=b1,
        gamma=jnp.ones((1, hidden_size), jnp.float32),   # BatchNorm1d weight
        beta=jnp.zeros((1, hidden_size), jnp.float32),   # BatchNorm1d bias
        w2=w2, b2=b2, w3=w3, b3=b3, w4=w4, b4=b4,
    )


def _reference_forward(x, p):
    """Pure-JAX reference mirroring the PyTorch forward (training-mode BN, with b1)."""
    h1 = x @ p["w1"] + p["b1"]
    mean = jnp.mean(h1, axis=0, keepdims=True)
    var = jnp.mean((h1 - mean) ** 2, axis=0, keepdims=True)
    h1 = (h1 - mean) / jnp.sqrt(var + 1e-5) * p["gamma"] + p["beta"]
    h1 = jnp.maximum(h1, 0.0)
    h2 = h1 @ p["w2"] + p["b2"]
    h3 = jnp.maximum(h2 @ p["w3"] + p["b3"], 0.0)
    h4 = h3 @ p["w4"] + p["b4"]
    return jax.nn.log_softmax(h4, axis=1)


if __name__ == "__main__":
    key = jax.random.PRNGKey(0)

    # Case 1: small demo shapes — recompute-fc1 path, single tile, no split.
    k1, k2, key = jax.random.split(key, 3)
    x1 = jax.random.normal(k1, (8, 16), jnp.float32)
    p1 = init_params(k2, 16, 32, 3)
    out1 = jax.block_until_ready(malware_identifier_forward(x1, p1))
    ref1 = _reference_forward(x1, p1)
    assert out1.shape == (8, 3)
    assert jnp.allclose(out1, ref1, atol=1e-4, rtol=1e-4), "case 1 mismatch vs reference"

    # Case 2: wider features + ragged batch — h1-cache path, 2-way stats split, padding.
    k3, k4, key = jax.random.split(key, 3)
    x2 = jax.random.normal(k3, (300, 256), jnp.float32)
    p2 = init_params(k4, 256, 64, 3)
    out2 = jax.block_until_ready(malware_identifier_forward(x2, p2, batch_tile=128))
    ref2 = _reference_forward(x2, p2)
    assert out2.shape == (300, 3)
    assert jnp.allclose(out2, ref2, atol=1e-4, rtol=1e-4), "case 2 mismatch vs reference"

    print("KERNEL_OK")
</pallas_src>

<mosaic_0001>
module attributes {stable_mosaic.version = 11 : i64} {
  func.func @_probe(%arg0: i32, %arg1: memref<8x128xf32, #tpu.memory_space<vmem>>, %arg2: memref<8x128xf32, #tpu.memory_space<vmem>>) attributes {dimension_semantics = [#tpu.dimension_semantics<arbitrary>], iteration_bounds = array<i64: 2>, scalar_prefetch = 0 : i64, scratch_operands = 0 : i64, tpu.core_type = #tpu.core_type<tc>, window_params = [{pipeline_mode = #tpu.pipeline_mode<synchronous>, transform_indices = @transform_0, window_bounds = array<i64: 8, 128>}, {pipeline_mode = #tpu.pipeline_mode<synchronous>, transform_indices = @transform_1, window_bounds = array<i64: 8, 128>}]} {
    %c0 = arith.constant 0 : index
    %c0_0 = arith.constant 0 : index
    %0 = vector.load %arg1[%c0, %c0_0] : memref<8x128xf32, #tpu.memory_space<vmem>>, vector<8x128xf32>
    %cst = arith.constant 1.000000e+00 : f32
    %1 = vector.broadcast %cst : f32 to vector<8x128xf32>
    %2 = arith.addf %0, %1 : vector<8x128xf32>
    %c0_1 = arith.constant 0 : index
    %c0_2 = arith.constant 0 : index
    %3 = vector.load %arg2[%c0_1, %c0_2] : memref<8x128xf32, #tpu.memory_space<vmem>>, vector<8x128xf32>
    tpu.vector_store %arg2[%c0_1, %c0_2], %2 {strides = array<i32>} : memref<8x128xf32, #tpu.memory_space<vmem>>, vector<8x128xf32>,
    return
  }
  func.func @transform_0(%arg0: i32) -> (i32, i32) {
    %c0_i32 = arith.constant 0 : i32
    %c0_i32_0 = arith.constant 0 : i32
    %c0_i32_1 = arith.constant 0 : i32
    return %c0_i32, %c0_i32_0 : i32, i32
  }
  func.func @transform_1(%arg0: i32) -> (i32, i32) {
    %c0_i32 = arith.constant 0 : i32
    %c0_i32_0 = arith.constant 0 : i32
    %c0_i32_1 = arith.constant 0 : i32
    return %c0_i32, %c0_i32_0 : i32, i32
  }
}

module attributes {stable_mosaic.version = 11 : i64} {
  func.func @_fc1_stats_kernel(%arg0: i32, %arg1: i32, %arg2: memref<8x16xf32, #tpu.memory_space<vmem>>, %arg3: memref<16x32xf32, #tpu.memory_space<vmem>>, %arg4: memref<8x32xf32, #tpu.memory_space<vmem>>, %arg5: memref<8x32xf32, #tpu.memory_space<vmem>>) attributes {dimension_semantics = [#tpu.dimension_semantics<parallel>, #tpu.dimension_semantics<arbitrary>], iteration_bounds = array<i64: 1, 1>, scalar_prefetch = 0 : i64, scratch_operands = 0 : i64, tpu.core_type = #tpu.core_type<tc>, window_params = [{transform_indices = @transform_0, window_bounds = array<i64: 8, 16>}, {pipeline_mode = #tpu.pipeline_mode<synchronous>, transform_indices = @transform_1, window_bounds = array<i64: 16, 32>}, {transform_indices = @transform_2, window_bounds = array<i64: 8, 32>}, {transform_indices = @transform_3, window_bounds = array<i64: 8, 32>}]} {
    %c0_i32 = arith.constant 0 : i32
    %0 = arith.cmpi eq, %arg1, %c0_i32 : i32
    %1 = arith.extui %0 : i1 to i32
    %c0_i32_0 = arith.constant 0 : i32
    %2 = arith.cmpi ne, %1, %c0_i32_0 : i32
    scf.if %2 {
      %cst_14 = arith.constant 0.000000e+00 : f32
      %19 = vector.broadcast %cst_14 : f32 to vector<8x32xf32>
      %c0_15 = arith.constant 0 : index
      %c0_16 = arith.constant 0 : index
      %20 = vector.load %arg4[%c0_15, %c0_16] : memref<8x32xf32, #tpu.memory_space<vmem>>, vector<8x32xf32>
      tpu.vector_store %arg4[%c0_15, %c0_16], %19 {strides = array<i32>} : memref<8x32xf32, #tpu.memory_space<vmem>>, vector<8x32xf32>,
      %cst_17 = arith.constant 0.000000e+00 : f32
      %21 = vector.broadcast %cst_17 : f32 to vector<8x32xf32>
      %c0_18 = arith.constant 0 : index
      %c0_19 = arith.constant 0 : index
      %22 = vector.load %arg5[%c0_18, %c0_19] : memref<8x32xf32, #tpu.memory_space<vmem>>, vector<8x32xf32>
      tpu.vector_store %arg5[%c0_18, %c0_19], %21 {strides = array<i32>} : memref<8x32xf32, #tpu.memory_space<vmem>>, vector<8x32xf32>,
    } else {
    }
    %c0 = arith.constant 0 : index
    %c0_1 = arith.constant 0 : index
    %3 = vector.load %arg2[%c0, %c0_1] : memref<8x16xf32, #tpu.memory_space<vmem>>, vector<8x16xf32>
    %c0_2 = arith.constant 0 : index
    %c0_3 = arith.constant 0 : index
    %4 = vector.load %arg3[%c0_2, %c0_3] : memref<16x32xf32, #tpu.memory_space<vmem>>, vector<16x32xf32>
    %cst = arith.constant dense<0.000000e+00> : vector<8x32xf32>
    %5 = tpu.matmul %3, %4, %cst {dimension_numbers = #tpu.dot_dimension_numbers<[1], [0], [0], [1], [0, 0, 1, 1], [], []>} : vector<8x16xf32>, vector<16x32xf32>, vector<8x32xf32> -> vector<8x32xf32>
    %c0_4 = arith.constant 0 : index
    %c0_5 = arith.constant 0 : index
    %6 = vector.load %arg4[%c0_4, %c0_5] : memref<8x32xf32, #tpu.memory_space<vmem>>, vector<8x32xf32>
    %cst_6 = arith.constant dense<0.000000e+00> : vector<32xf32>
    %7 = vector.multi_reduction <add>, %5, %cst_6 [0] : vector<8x32xf32> to vector<32xf32>
    %8 = vector.shape_cast %7 : vector<32xf32> to vector<1x32xf32>
    %9 = vector.broadcast %8 : vector<1x32xf32> to vector<8x32xf32>
    %10 = arith.addf %6, %9 : vector<8x32xf32>
    %c0_7 = arith.constant 0 : index
    %c0_8 = arith.constant 0 : index
    %11 = vector.load %arg4[%c0_7, %c0_8] : memref<8x32xf32, #tpu.memory_space<vmem>>, vector<8x32xf32>
    tpu.vector_store %arg4[%c0_7, %c0_8], %10 {strides = array<i32>} : memref<8x32xf32, #tpu.memory_space<vmem>>, vector<8x32xf32>,
    %c0_9 = arith.constant 0 : index
    %c0_10 = arith.constant 0 : index
    %12 = vector.load %arg5[%c0_9, %c0_10] : memref<8x32xf32, #tpu.memory_space<vmem>>, vector<8x32xf32>
    %13 = arith.mulf %5, %5 : vector<8x32xf32>
    %cst_11 = arith.constant dense<0.000000e+00> : vector<32xf32>
    %14 = vector.multi_reduction <add>, %13, %cst_11 [0] : vector<8x32xf32> to vector<32xf32>
    %15 = vector.shape_cast %14 : vector<32xf32> to vector<1x32xf32>
    %16 = vector.broadcast %15 : vector<1x32xf32> to vector<8x32xf32>
    %17 = arith.addf %12, %16 : vector<8x32xf32>
    %c0_12 = arith.constant 0 : index
    %c0_13 = arith.constant 0 : index
    %18 = vector.load %arg5[%c0_12, %c0_13] : memref<8x32xf32, #tpu.memory_space<vmem>>, vector<8x32xf32>
    tpu.vector_store %arg5[%c0_12, %c0_13], %17 {strides = array<i32>} : memref<8x32xf32, #tpu.memory_space<vmem>>, vector<8x32xf32>,
    return
  }
  func.func @transform_0(%arg0: i32, %arg1: i32) -> (i32, i32) {
    %c1_i32 = arith.constant 1 : i32
    %0 = arith.muli %arg0, %c1_i32 : i32
    %1 = arith.addi %0, %arg1 : i32
    %c0_i32 = arith.constant 0 : i32
    %c0_i32_0 = arith.constant 0 : i32
    return %1, %c0_i32 : i32, i32
  }
  func.func @transform_1(%arg0: i32, %arg1: i32) -> (i32, i32) {
    %c0_i32 = arith.constant 0 : i32
    %c0_i32_0 = arith.constant 0 : i32
    %c0_i32_1 = arith.constant 0 : i32
    return %c0_i32, %c0_i32_0 : i32, i32
  }
  func.func @transform_2(%arg0: i32, %arg1: i32) -> (i32, i32) {
    %c0_i32 = arith.constant 0 : i32
    %c0_i32_0 = arith.constant 0 : i32
    return %arg0, %c0_i32 : i32, i32
  }
  func.func @transform_3(%arg0: i32, %arg1: i32) -> (i32, i32) {
    %c0_i32 = arith.constant 0 : i32
    %c0_i32_0 = arith.constant 0 : i32
    return %arg0, %c0_i32 : i32, i32
  }
}

</mosaic_0001>

<bundles_post_ra>
// kernel: tpu_custom_call.1
= control target key start
LH: loop header
LB: loop body
LE: loop exit
PB: predicated region body
PF: predicated region fallthrough
CT: control target
= control target key end

     0   :  { %6 = vsyncpa [#allocation3], 0  ;;  %s305_s0 = inlined_call_operand.hbm [shape: f32[8,128], index: 0, kind: input, shape index: {}]   ;;  %s306_s1 = inlined_call_operand.hbm [shape: f32[8,128], index: 1, kind: output, shape index: {}]  }
   0x1   :  { %7 = vsyncpa [#allocation4], 0  ;;  %s258_s6 = smov 0  }
   0x2 LB: > { %s145_s7 = sadd.s32 4294967295, %s244_s6   ;;  %p146_p0 = scmp.ge.s32.totalorder %s244_s6, 1  ;;  %s244_s6 = sphi %s258_s6, %s13_s6  }
   0x3   : > { %p60_p1 = scmp.lt.s32.totalorder %s244_s6, 3  ;;  %p270_p3 = scmp.eq.s32.totalorder %s145_s7, 0 }
   0x4   : > { %s246_s10 = smov [#allocation2]  }
   0x5   : > { %p266_p2 = pnand %p146_p0, %p60_p1  ;;  %s73_s11 = sshll.u32 %s246_s10, 4  ;;  %s74_s11 = int_to_ptr.vmem [resolvable:$true] %s73_s11 }
   0x6   : > { %s191_s12 = scalar_lea.vmem %s74_s11, 128  ;;  %p199_p10 = scmp.lt.s32.totalorder %s74_s11, %s74_s11 }
   0x7   : > { %p162_p4 = pneg %p266_p2  ;;  %p192_p7 = scmp.ne.s32.totalorder %s74_s11, %s191_s12 }
   0x8   : > { %p200_p11 = scmp.lt.s32.totalorder %s191_s12, %s191_s12 }
   0x9   : > { %p163_p5 = pnand %p270_p3, %p162_p4 }
   0xa   : > { %p201_p12 = por %p200_p11, %p199_p10 }
   0xb   : > { %p182_p6 = pneg %p163_p5 }
   0xd   : > { %p194_p8 = pnand %p192_p7, %p182_p6 }
   0xf   : > { %p195_p9 = pneg %p194_p8 }
  0x11   : > { %p202_p13 = pnand %p201_p12, %p195_p9 }
  0x13   : > { %205 = shalt.err (!%p202_p13)
}
  0x14   : > { %165 = dma.hbm_to_vmem [thread:$0]  (!%p163_p5), %s305_s0, 128, %s74_s11, [#allocation3]  }
  0x15   : > { %86 = sbr.rel (%p266_p2) target bundleno = 42 (0x2a), region = 24 }
  0x1a   : > { %235 = dma.done.wait (%p270_p3), [#allocation3], 128  }
  0x1b   : > { %237 = vsyncadd (%p270_p3), [#allocation3], 4294967168  ;;  %s247_s15 = smov [#allocation5]   ;;  %v96_v0 = vld [vmem:[#allocation2] sm:$0xff]  ;;  %p287_p0 = scmp.eq.s32.totalorder %s145_s7, 1 }
  0x1c   : > { %s106_s16 = sshll.u32 %s247_s15, 4  ;;  %v97_v1 = vadd.f32 1.0, %v96_v0  ;;  %s107_s16 = int_to_ptr.vmem [resolvable:$true] %s106_s16 }
  0x1d   : > { %s206_s18 = scalar_lea.vmem %s107_s16, 128  ;;  %p213_p5 = scmp.lt.s32.totalorder %s107_s16, %s107_s16 }
  0x1e   : > { %98 = vst [vmem:[#allocation5] sm:$0xff] %v97_v1  ;;  %p207_p1 = scmp.ne.s32.totalorder %s107_s16, %s206_s18  ;;  %p214_p6 = scmp.lt.s32.totalorder %s206_s18, %s206_s18 }
  0x20   : > { %p208_p2 = pnand %p207_p1, %p287_p0  ;;  %p215_p7 = por %p214_p6, %p213_p5 }
  0x22   : > { %p209_p4 = pneg %p208_p2 }
  0x24   : > { %p216_p3 = pnand %p215_p7, %p209_p4 }
  0x26   : > { %219 = shalt.err (!%p216_p3)
}
  0x27   : > { %159 = dma.vmem_to_hbm [thread:$0]  (%p287_p0), %s107_s16, 128, %s306_s1, [#allocation4]  }
  0x28   : > { %239 = dma.done.wait (%p287_p0), [#allocation4], 128  }
  0x29   : > { %241 = vsyncadd (%p287_p0), [#allocation4], 4294967168 }
  0x2a PF: > { %s13_s6 = sadd.s32 1, %s244_s6  }
  0x2b   : > { %p10_p8 = scmp.ge.s32.totalorder %s13_s6, 4  }
  0x2d   :  { %12 = sbr.rel (!%p10_p8) target bundleno = 2 (0x2), region = 53 }
  0x32   :  { %119 = vsyncpa [#allocation3], 1 }
  0x33   :  { %121 = vsyncpa [#allocation3 + $0x1], 1 }
  0x34   :  { %122 = vsyncpa [#allocation4], 1 }
  0x35   :  { %124 = vsyncpa [#allocation4 + $0x1], 1 }

// kernel: tpu_custom_call.1
= control target key start
LH: loop header
LB: loop body
LE: loop exit
PB: predicated region body
PF: predicated region fallthrough
CT: control target
= control target key end

     0   :  { %9 = vsyncpa [#allocation3], 0  ;;  %s334_s0 = inlined_call_operand.hbm [shape: f32[8,16], index: 0, kind: input, shape index: {}]   ;;  %s335_s1 = inlined_call_operand.hbm [shape: f32[16,32], index: 1, kind: input, shape index: {}]   ;;  %s336_s2 = inlined_call_operand.hbm [shape: f32[8,32], index: 2, kind: output, shape index: {0}]   ;;  %s337_s3 = inlined_call_operand.hbm [shape: f32[8,32], index: 3, kind: output, shape index: {1}]  }
   0x1   :  { %10 = vsyncpa [#allocation6], 0 }
   0x2   :  { %11 = vsyncpa [#allocation4], 0 }
   0x3   :  { %12 = vsyncpa [#allocation9], 0  ;;  %s288_s12 = smov [#allocation2]   ;;  %s289_s14 = smov [#allocation5]  }
   0x4   :  { %s22_s13 = sshll.u32 %s288_s12, 4  ;;  %s31_s15 = sshll.u32 %s289_s14, 4  ;;  %s23_s13 = int_to_ptr.vmem [resolvable:$true] %s22_s13  ;;  %s32_s15 = int_to_ptr.vmem [resolvable:$true] %s31_s15 }
   0x5   :  { %s208_s16 = scalar_lea.vmem %s23_s13, 128  ;;  %p213_p1 = scmp.lt.s32.totalorder %s23_s13, %s23_s13 }
   0x6   :  { %p209_p0 = scmp.ne.s32.totalorder %s23_s13, %s208_s16  ;;  %p214_p2 = scmp.lt.s32.totalorder %s208_s16, %s208_s16 }
   0x8   :  { %p215_p3 = por %p214_p2, %p213_p1 }
   0xa   :  { %p216_p4 = pnand %p215_p3, %p209_p0 }
   0xc   :  { %219 = shalt.err (!%p216_p4)
}
   0xd   :  { %25 = dma.hbm_to_vmem [thread:$0]  %s334_s0, 128, %s23_s13, [#allocation3]  }
   0xe   :  { %s228_s19 = scalar_lea.vmem %s32_s15, 256  ;;  %p233_p6 = scmp.lt.s32.totalorder %s32_s15, %s32_s15 }
   0xf   :  { %p229_p5 = scmp.ne.s32.totalorder %s32_s15, %s228_s19  ;;  %p234_p7 = scmp.lt.s32.totalorder %s228_s19, %s228_s19 }
  0x11   :  { %p235_p8 = por %p234_p7, %p233_p6 }
  0x13   :  { %p236_p9 = pnand %p235_p8, %p229_p5 }
  0x15   :  { %239 = shalt.err (!%p236_p9)
}
  0x16   :  { %s290_s20 = smov 128   ;;  %s291_s21 = smov 8  }
  0x17   :  { %37 = dma.hbm_to_vmem [thread:$0]  %s335_s1, 256, %s32_s15, [#allocation6], %s290_s20, %s290_s20, %s291_s21  }
  0x18   :  { %280 = dma.done.wait [#allocation3], 128  }
  0x19   :  { %281 = vsyncadd [#allocation3], 4294967168 }
  0x1a   :  { %282 = dma.done.wait [#allocation6], 256  }
  0x1b   :  { %283 = vsyncadd [#allocation6], 4294967040  ;;  %vm49_vm0 = vcmask 261120   ;;  %v292_v0 = vmov 0.0   ;;  %vm293_vm1 = vmmov 0   ;;  %v54_v1 = vld [vmem:[#allocation5 + $0x8] sm:$0xff] }
  0x1c   :  { %185 = vmatprep.subr.mxu0 %v292_v0  ;;  %189 = vmatprep.mubr.msk.f32.mxu0 %vm293_vm1, %v292_v0  ;;  %50 = vst.msk [vmem:[#allocation7] sm:$0xff] %vm49_vm0, %v292_v0  ;;  %51 = vst.msk [vmem:[#allocation8] sm:$0xff] %vm49_vm0, %v292_v0  ;;  %v53_v2 = vld [vmem:[#allocation5] sm:$0xff]  ;;  %v52_v3 = vld [vmem:[#allocation2] sm:$0xff]  ;;  %vm55_vm2 = vcmask 130048   ;;  %s294_s0 = smov [#allocation7]  }
  0x1d   :  { %186 = vmatpush3.msra.mxu0 %v54_v1  ;;  %s157_s1 = sshll.u32 %s294_s0, 4  ;;  %s295_s24 = smov [#allocation8]   ;;  %s158_s1 = int_to_ptr.vmem [resolvable:$true] %s157_s1 }
  0x1e   :  { %187 = vmatprep.subr.mxu0 %v292_v0  ;;  %s167_s25 = sshll.u32 %s295_s24, 4  ;;  %s240_s26 = scalar_lea.vmem %s158_s1, 128  ;;  %s168_s25 = int_to_ptr.vmem [resolvable:$true] %s167_s25 }
  0x1f   :  { %188 = vmatpush3.msra.mxu0 %v53_v2  ;;  %p241_p10 = scmp.ne.s32.totalorder %s158_s1, %s240_s26  ;;  %p245_p11 = scmp.lt.s32.totalorder %s158_s1, %s158_s1 }
  0x20   :  { %190 = vmatmul.mubr.msk.f32.vlgmr.msra.gmra.mxu0 %vm55_vm2, %v52_v3  ;;  %p246_p12 = scmp.lt.s32.totalorder %s240_s26, %s240_s26 }
  0x22   :  { %p247_p13 = por %p246_p12, %p245_p11 }
  0x23   :  { %v129_v18 = vld [vmem:[#allocation7] sm:$0xff]  ;;  %v140_v21 = vld [vmem:[#allocation8] sm:$0xff] }
  0x24   :  { %p248_p0 = pnand %p247_p13, %p241_p10 }
  0xe0   :  { %v125_v4 = vpop.f32.mrf.mxu0 }
  0xe1   :  { %v131_v5 = vsel %vm49_vm0, %v125_v4, 0.0  ;;  %v141_v6 = vmul.f32 %v125_v4, %v125_v4 }
  0xe2   :  { %v132_v7 = vrot.slane %v131_v5, 4  ;;  %v191_v8 = vpop.f32.mrf.mxu0 }
  0xe3   :  { %v142_v9 = vsel %vm49_vm0, %v141_v6, 0.0 }
  0xe4   :  { %v133_v10 = vadd.f32 %v132_v7, %v131_v5  ;;  %v143_v11 = vrot.slane %v142_v9, 4 }
  0xe6   :  { %v134_v12 = vrot.slane %v133_v10, 2  ;;  %v144_v13 = vadd.f32 %v143_v11, %v142_v9 }
  0xe8   :  { %v135_v14 = vadd.f32 %v134_v12, %v133_v10  ;;  %v145_v15 = vrot.slane %v144_v13, 2 }
  0xea   :  { %v136_v16 = vrot.slane %v135_v14, 1  ;;  %v146_v17 = vadd.f32 %v145_v15, %v144_v13 }
  0xec   :  { %v137_v19 = vadd.f32 %v136_v16, %v135_v14  ;;  %v147_v20 = vrot.slane %v146_v17, 1 }
  0xee   :  { %v148_v22 = vadd.f32 %v147_v20, %v146_v17  ;;  %v138_v23 = vadd.f32 %v137_v19, %v129_v18 }
  0xf0   :  { %139 = vst.msk [vmem:[#allocation7] sm:$0xff] %vm49_vm0, %v138_v23  ;;  %v149_v24 = vadd.f32 %v148_v22, %v140_v21 }
  0xf1   :  { %251 = shalt.err (!%p248_p0)
}
  0xf2   :  { %160 = dma.vmem_to_hbm [thread:$0]  %s158_s1, 128, %s336_s2, [#allocation4]   ;;  %150 = vst.msk [vmem:[#allocation8] sm:$0xff] %vm49_vm0, %v149_v24 }
  0xf3   :  { %s260_s29 = scalar_lea.vmem %s168_s25, 128  ;;  %p265_p2 = scmp.lt.s32.totalorder %s168_s25, %s168_s25 }
  0xf4   :  { %p261_p1 = scmp.ne.s32.totalorder %s168_s25, %s260_s29  ;;  %p266_p3 = scmp.lt.s32.totalorder %s260_s29, %s260_s29 }
  0xf6   :  { %p267_p4 = por %p266_p3, %p265_p2 }
  0xf8   :  { %p268_p5 = pnand %p267_p4, %p261_p1 }
  0xfa   :  { %271 = shalt.err (!%p268_p5)
}
  0xfb   :  { %170 = dma.vmem_to_hbm [thread:$0]  %s168_s25, 128, %s337_s3, [#allocation9]  }
  0xfc   :  { %284 = dma.done.wait [#allocation4], 128  }
  0xfd   :  { %285 = vsyncadd [#allocation4], 4294967168 }
  0xfe   :  { %286 = dma.done.wait [#allocation9], 128  }
  0xff   :  { %287 = vsyncadd [#allocation9], 4294967168 }
 0x100   :  { %177 = vsyncpa [#allocation3], 1 }
 0x101   :  { %178 = vsyncpa [#allocation6], 1 }
 0x102   :  { %179 = vsyncpa [#allocation4], 1 }
 0x103   :  { %180 = vsyncpa [#allocation9], 1 }

</bundles_post_ra>
